<compile_context>
chip_gen: v6e
topology: v6e:2x2x1
jax: 0.10.0
libtpu: 0.0.40
codegen_flags: <defaults>
</compile_context>

<pallas_src>
import jax
import jax.numpy as jnp
import numpy as np
from jax.experimental import pallas as pl
from jax.experimental.pallas import tpu as pltpu


def _bottleneck_kernel(x_ref, w1_ref, s1_ref, b1_ref,
                       w2b_ref, s2_ref, b2_ref,
                       w3_ref, s3_ref, b3_ref,
                       o_ref, pad_ref):
    NB, H, WCin = x_ref.shape          # lane-dense input slab (NB, H, W*Cin)
    Wd = w2b_ref.shape[1]              # W * width
    WCout = w3_ref.shape[1]            # W * Cout

    # Rows are (image, h) pairs; lanes are (w, channel). Leading-dim reshape
    # only (layout trivial).
    x = x_ref[...].reshape(NB * H, WCin)

    # ---- conv1 (1x1) + bn1 + relu: one block-diagonal full-slab matmul ------
    h1 = jnp.dot(x, w1_ref[...], preferred_element_type=jnp.float32)
    h1 = jnp.maximum(h1 * s1_ref[...] + b1_ref[...], 0.0)          # (NB*H, Wd)

    # ---- conv2 (3x3, stride=1, pad=1) + bn2 + relu --------------------------
    # Horizontal taps are folded into banded weights w2b[kh]; vertical taps use
    # an H-halo scratch. Only the two halo rows are zeroed (interior is fully
    # overwritten).
    zrow = jnp.zeros((NB, 1, Wd), jnp.float32)
    pad_ref[:, 0:1, :] = zrow
    pad_ref[:, H + 1:H + 2, :] = zrow
    pad_ref[:, 1:H + 1, :] = h1.reshape(NB, H, Wd)

    acc = jnp.zeros((NB * H, Wd), jnp.float32)
    for kh in range(3):                                            # 3 slabs total
        rows = pad_ref[:, kh:kh + H, :].reshape(NB * H, Wd)
        acc = acc + jnp.dot(rows, w2b_ref[kh],
                            preferred_element_type=jnp.float32)
    h2 = jnp.maximum(acc * s2_ref[...] + b2_ref[...], 0.0)         # (NB*H, Wd)

    # ---- conv3 (1x1) + bn3 + residual add + relu (lane-dense store) ---------
    h3 = jnp.dot(h2, w3_ref[...], preferred_element_type=jnp.float32)
    out = jnp.maximum(h3 * s3_ref[...] + b3_ref[...] + x, 0.0)     # (NB*H, WCout)
    o_ref[...] = out.reshape(NB, H, WCout).astype(o_ref.dtype)


def bottleneck_forward(x_nhwc, w1, s1, b1, w2, s2, b2, w3, s3, b3,
                       *, batch_block=None):
    """Bottleneck forward (stride=1, groups=1, downsample=None), inference BN.

    x_nhwc: (N, H, W, Cin) f32
    w1: (Cin, width); w2: (3, 3, width, width) HWIO; w3: (width, Cout)
    s*/b*: folded BatchNorm scale/bias vectors per conv output channel.
    """
    N, H, W, Cin = x_nhwc.shape
    width = w1.shape[1]
    Cout = w3.shape[1]
    assert Cin == Cout, "residual add with downsample=None needs Cin == Cout"

    NB = N if batch_block is None else batch_block
    assert N % NB == 0

    WCin, Wd, WCout = W * Cin, W * width, W * Cout
    f32 = jnp.float32

    # Wrapper-side layout plumbing (one-time, outside the kernel).
    eyeW = jnp.eye(W, dtype=f32)
    w1_blk = jnp.kron(eyeW, w1.astype(f32))                # (W*Cin,  W*width)
    w3_blk = jnp.kron(eyeW, w3.astype(f32))                # (W*width, W*Cout)

    bands = []
    for kh in range(3):
        B = jnp.zeros((Wd, Wd), f32)
        for kw in range(3):
            # w_in = w_out + kw - 1  (zero off-band blocks give the W padding)
            S = jnp.eye(W, k=1 - kw, dtype=f32)
            B = B + jnp.kron(S, w2[kh, kw].astype(f32))
        bands.append(B)
    w2_bands = jnp.stack(bands)                            # (3, Wd, Wd)

    tile = lambda v, c: jnp.tile(v.reshape(-1).astype(f32), W).reshape(1, W * c)
    s1f, b1f = tile(s1, width), tile(b1, width)
    s2f, b2f = tile(s2, width), tile(b2, width)
    s3f, b3f = tile(s3, Cout), tile(b3, Cout)

    x_flat = x_nhwc.reshape(N, H, WCin)                    # lane-dense input

    const2 = lambda b: (0, 0)
    const3 = lambda b: (0, 0, 0)

    out_flat = pl.pallas_call(
        _bottleneck_kernel,
        out_shape=jax.ShapeDtypeStruct((N, H, WCout), jnp.float32),
        grid_spec=pltpu.PrefetchScalarGridSpec(
            num_scalar_prefetch=0,
            grid=(N // NB,),
            in_specs=[
                pl.BlockSpec((NB, H, WCin), lambda b: (b, 0, 0)),
                pl.BlockSpec((WCin, Wd), const2),
                pl.BlockSpec((1, Wd), const2),
                pl.BlockSpec((1, Wd), const2),
                pl.BlockSpec((3, Wd, Wd), const3),
                pl.BlockSpec((1, Wd), const2),
                pl.BlockSpec((1, Wd), const2),
                pl.BlockSpec((Wd, WCout), const2),
                pl.BlockSpec((1, WCout), const2),
                pl.BlockSpec((1, WCout), const2),
            ],
            out_specs=pl.BlockSpec((NB, H, WCout), lambda b: (b, 0, 0)),
            scratch_shapes=[
                pltpu.VMEM((NB, H + 2, Wd), jnp.float32),   # H-halo conv2 input
            ],
        ),
        compiler_params=pltpu.CompilerParams(
            dimension_semantics=("parallel",)),              # batch axis: megacore
    )(x_flat, w1_blk, s1f, b1f, w2_bands, s2f, b2f, w3_blk, s3f, b3f)

    return out_flat.reshape(N, H, W, Cout)


if __name__ == "__main__":
    key = jax.random.PRNGKey(0)
    N, H, W = 2, 8, 8
    in_channel, out_channel = 16, 4                 # expansion=4 -> Cout = 16 = Cin
    groups, width_per_group = 1, 64
    width = int(out_channel * (width_per_group / 64.0)) * groups   # = 4
    Cout = out_channel * 4
    eps = 1e-5

    ks = jax.random.split(key, 16)
    x_nchw = jax.random.normal(ks[0], (N, in_channel, H, W), jnp.float32)

    w1 = 0.1 * jax.random.normal(ks[1], (in_channel, width), jnp.float32)
    w2 = 0.1 * jax.random.normal(ks[2], (3, 3, width, width), jnp.float32)
    w3 = 0.1 * jax.random.normal(ks[3], (width, Cout), jnp.float32)

    def bn_params(kg, kb, km, kv, c):
        gamma = 1.0 + 0.1 * jax.random.normal(kg, (c,), jnp.float32)
        beta = 0.1 * jax.random.normal(kb, (c,), jnp.float32)
        mean = 0.1 * jax.random.normal(km, (c,), jnp.float32)
        var = 1.0 + 0.1 * jax.random.uniform(kv, (c,), jnp.float32)
        return gamma, beta, mean, var

    g1, bt1, m1, v1 = bn_params(ks[4], ks[5], ks[6], ks[7], width)
    g2, bt2, m2, v2 = bn_params(ks[8], ks[9], ks[10], ks[11], width)
    g3, bt3, m3, v3 = bn_params(ks[12], ks[13], ks[14], ks[15], Cout)

    def fold(g, b, m, v):
        s = g / jnp.sqrt(v + eps)
        return s, b - m * s

    s1, b1 = fold(g1, bt1, m1, v1)
    s2, b2 = fold(g2, bt2, m2, v2)
    s3, b3 = fold(g3, bt3, m3, v3)

    x_nhwc = jnp.transpose(x_nchw, (0, 2, 3, 1))

    out = bottleneck_forward(x_nhwc, w1, s1, b1, w2, s2, b2, w3, s3, b3)
    out = jax.block_until_ready(out)

    # ---- pure-JAX reference (XLA convs) for correctness ----------------------
    def bn(y, g, b, m, v):
        return (y - m) / jnp.sqrt(v + eps) * g + b

    dn = ('NHWC', 'HWIO', 'NHWC')
    r = jax.lax.conv_general_dilated(x_nhwc, w1[None, None], (1, 1), 'VALID',
                                     dimension_numbers=dn)
    r = jax.nn.relu(bn(r, g1, bt1, m1, v1))
    r = jax.lax.conv_general_dilated(r, w2, (1, 1), ((1, 1), (1, 1)),
                                     dimension_numbers=dn)
    r = jax.nn.relu(bn(r, g2, bt2, m2, v2))
    r = jax.lax.conv_general_dilated(r, w3[None, None], (1, 1), 'VALID',
                                     dimension_numbers=dn)
    r = bn(r, g3, bt3, m3, v3)
    r = jax.nn.relu(r + x_nhwc)

    np.testing.assert_allclose(np.asarray(out), np.asarray(r), rtol=2e-3, atol=2e-3)
    print("KERNEL_OK")
</pallas_src>

<mosaic_0001>
module attributes {stable_mosaic.version = 11 : i64} {
  func.func @_bottleneck_kernel(%arg0: i32, %arg1: memref<2x8x128xf32, #tpu.memory_space<vmem>>, %arg2: memref<128x32xf32, #tpu.memory_space<vmem>>, %arg3: memref<1x32xf32, #tpu.memory_space<vmem>>, %arg4: memref<1x32xf32, #tpu.memory_space<vmem>>, %arg5: memref<3x32x32xf32, #tpu.memory_space<vmem>>, %arg6: memref<1x32xf32, #tpu.memory_space<vmem>>, %arg7: memref<1x32xf32, #tpu.memory_space<vmem>>, %arg8: memref<32x128xf32, #tpu.memory_space<vmem>>, %arg9: memref<1x128xf32, #tpu.memory_space<vmem>>, %arg10: memref<1x128xf32, #tpu.memory_space<vmem>>, %arg11: memref<2x8x128xf32, #tpu.memory_space<vmem>>, %arg12: memref<2x10x32xf32, #tpu.memory_space<vmem>>) attributes {dimension_semantics = [#tpu.dimension_semantics<parallel>], iteration_bounds = array<i64: 1>, scalar_prefetch = 0 : i64, scratch_operands = 1 : i64, tpu.core_type = #tpu.core_type<tc>, window_params = [{transform_indices = @transform_0, window_bounds = array<i64: 2, 8, 128>}, {pipeline_mode = #tpu.pipeline_mode<synchronous>, transform_indices = @transform_1, window_bounds = array<i64: 128, 32>}, {pipeline_mode = #tpu.pipeline_mode<synchronous>, transform_indices = @transform_2, window_bounds = array<i64: 1, 32>}, {pipeline_mode = #tpu.pipeline_mode<synchronous>, transform_indices = @transform_3, window_bounds = array<i64: 1, 32>}, {pipeline_mode = #tpu.pipeline_mode<synchronous>, transform_indices = @transform_4, window_bounds = array<i64: 3, 32, 32>}, {pipeline_mode = #tpu.pipeline_mode<synchronous>, transform_indices = @transform_5, window_bounds = array<i64: 1, 32>}, {pipeline_mode = #tpu.pipeline_mode<synchronous>, transform_indices = @transform_6, window_bounds = array<i64: 1, 32>}, {pipeline_mode = #tpu.pipeline_mode<synchronous>, transform_indices = @transform_7, window_bounds = array<i64: 32, 128>}, {pipeline_mode = #tpu.pipeline_mode<synchronous>, transform_indices = @transform_8, window_bounds = array<i64: 1, 128>}, {pipeline_mode = #tpu.pipeline_mode<synchronous>, transform_indices = @transform_9, window_bounds = array<i64: 1, 128>}, {transform_indices = @transform_10, window_bounds = array<i64: 2, 8, 128>}]} {
    %c0 = arith.constant 0 : index
    %c0_0 = arith.constant 0 : index
    %c0_1 = arith.constant 0 : index
    %0 = vector.load %arg1[%c0, %c0_0, %c0_1] : memref<2x8x128xf32, #tpu.memory_space<vmem>>, vector<2x8x128xf32>
    %1 = vector.shape_cast %0 : vector<2x8x128xf32> to vector<16x128xf32>
    %c0_2 = arith.constant 0 : index
    %c0_3 = arith.constant 0 : index
    %2 = vector.load %arg2[%c0_2, %c0_3] : memref<128x32xf32, #tpu.memory_space<vmem>>, vector<128x32xf32>
    %cst = arith.constant dense<0.000000e+00> : vector<16x32xf32>
    %3 = tpu.matmul %1, %2, %cst {dimension_numbers = #tpu.dot_dimension_numbers<[1], [0], [0], [1], [0, 0, 1, 1], [], []>} : vector<16x128xf32>, vector<128x32xf32>, vector<16x32xf32> -> vector<16x32xf32>
    %c0_4 = arith.constant 0 : index
    %c0_5 = arith.constant 0 : index
    %4 = vector.load %arg3[%c0_4, %c0_5] : memref<1x32xf32, #tpu.memory_space<vmem>>, vector<1x32xf32>
    %5 = vector.broadcast %4 : vector<1x32xf32> to vector<16x32xf32>
    %6 = arith.mulf %3, %5 : vector<16x32xf32>
    %c0_6 = arith.constant 0 : index
    %c0_7 = arith.constant 0 : index
    %7 = vector.load %arg4[%c0_6, %c0_7] : memref<1x32xf32, #tpu.memory_space<vmem>>, vector<1x32xf32>
    %8 = vector.broadcast %7 : vector<1x32xf32> to vector<16x32xf32>
    %9 = arith.addf %6, %8 : vector<16x32xf32>
    %cst_8 = arith.constant 0.000000e+00 : f32
    %10 = vector.broadcast %cst_8 : f32 to vector<16x32xf32>
    %11 = arith.maximumf %9, %10 : vector<16x32xf32>
    %cst_9 = arith.constant 0.000000e+00 : f32
    %12 = vector.broadcast %cst_9 : f32 to vector<2x1x32xf32>
    %c0_10 = arith.constant 0 : index
    %c0_11 = arith.constant 0 : index
    %c0_12 = arith.constant 0 : index
    %13 = vector.load %arg12[%c0_10, %c0_11, %c0_12] : memref<2x10x32xf32, #tpu.memory_space<vmem>>, vector<2x1x32xf32>
    tpu.vector_store %arg12[%c0_10, %c0_11, %c0_12], %12 {strides = array<i32>} : memref<2x10x32xf32, #tpu.memory_space<vmem>>, vector<2x1x32xf32>,
    %c0_13 = arith.constant 0 : index
    %c9 = arith.constant 9 : index
    %c0_14 = arith.constant 0 : index
    %14 = vector.load %arg12[%c0_13, %c9, %c0_14] : memref<2x10x32xf32, #tpu.memory_space<vmem>>, vector<2x1x32xf32>
    tpu.vector_store %arg12[%c0_13, %c9, %c0_14], %12 {strides = array<i32>} : memref<2x10x32xf32, #tpu.memory_space<vmem>>, vector<2x1x32xf32>,
    %15 = vector.shape_cast %11 : vector<16x32xf32> to vector<2x8x32xf32>
    %c0_15 = arith.constant 0 : index
    %c1 = arith.constant 1 : index
    %c0_16 = arith.constant 0 : index
    %16 = vector.load %arg12[%c0_15, %c1, %c0_16] : memref<2x10x32xf32, #tpu.memory_space<vmem>>, vector<2x8x32xf32>
    tpu.vector_store %arg12[%c0_15, %c1, %c0_16], %15 {strides = array<i32>} : memref<2x10x32xf32, #tpu.memory_space<vmem>>, vector<2x8x32xf32>,
    %cst_17 = arith.constant 0.000000e+00 : f32
    %17 = vector.broadcast %cst_17 : f32 to vector<16x32xf32>
    %c0_18 = arith.constant 0 : index
    %c0_19 = arith.constant 0 : index
    %c0_20 = arith.constant 0 : index
    %18 = vector.load %arg12[%c0_18, %c0_19, %c0_20] : memref<2x10x32xf32, #tpu.memory_space<vmem>>, vector<2x8x32xf32>
    %19 = vector.shape_cast %18 : vector<2x8x32xf32> to vector<16x32xf32>
    %c0_21 = arith.constant 0 : index
    %c0_22 = arith.constant 0 : index
    %c0_23 = arith.constant 0 : index
    %20 = vector.load %arg5[%c0_21, %c0_22, %c0_23] : memref<3x32x32xf32, #tpu.memory_space<vmem>>, vector<1x32x32xf32>
    %21 = vector.shape_cast %20 : vector<1x32x32xf32> to vector<32x32xf32>
    %cst_24 = arith.constant dense<0.000000e+00> : vector<16x32xf32>
    %22 = tpu.matmul %19, %21, %cst_24 {dimension_numbers = #tpu.dot_dimension_numbers<[1], [0], [0], [1], [0, 0, 1, 1], [], []>} : vector<16x32xf32>, vector<32x32xf32>, vector<16x32xf32> -> vector<16x32xf32>
    %23 = arith.addf %17, %22 : vector<16x32xf32>
    %c0_25 = arith.constant 0 : index
    %c1_26 = arith.constant 1 : index
    %c0_27 = arith.constant 0 : index
    %24 = vector.load %arg12[%c0_25, %c1_26, %c0_27] : memref<2x10x32xf32, #tpu.memory_space<vmem>>, vector<2x8x32xf32>
    %25 = vector.shape_cast %24 : vector<2x8x32xf32> to vector<16x32xf32>
    %c1_28 = arith.constant 1 : index
    %c0_29 = arith.constant 0 : index
    %c0_30 = arith.constant 0 : index
    %26 = vector.load %arg5[%c1_28, %c0_29, %c0_30] : memref<3x32x32xf32, #tpu.memory_space<vmem>>, vector<1x32x32xf32>
    %27 = vector.shape_cast %26 : vector<1x32x32xf32> to vector<32x32xf32>
    %cst_31 = arith.constant dense<0.000000e+00> : vector<16x32xf32>
    %28 = tpu.matmul %25, %27, %cst_31 {dimension_numbers = #tpu.dot_dimension_numbers<[1], [0], [0], [1], [0, 0, 1, 1], [], []>} : vector<16x32xf32>, vector<32x32xf32>, vector<16x32xf32> -> vector<16x32xf32>
    %29 = arith.addf %23, %28 : vector<16x32xf32>
    %c0_32 = arith.constant 0 : index
    %c2 = arith.constant 2 : index
    %c0_33 = arith.constant 0 : index
    %30 = vector.load %arg12[%c0_32, %c2, %c0_33] : memref<2x10x32xf32, #tpu.memory_space<vmem>>, vector<2x8x32xf32>
    %31 = vector.shape_cast %30 : vector<2x8x32xf32> to vector<16x32xf32>
    %c2_34 = arith.constant 2 : index
    %c0_35 = arith.constant 0 : index
    %c0_36 = arith.constant 0 : index
    %32 = vector.load %arg5[%c2_34, %c0_35, %c0_36] : memref<3x32x32xf32, #tpu.memory_space<vmem>>, vector<1x32x32xf32>
    %33 = vector.shape_cast %32 : vector<1x32x32xf32> to vector<32x32xf32>
    %cst_37 = arith.constant dense<0.000000e+00> : vector<16x32xf32>
    %34 = tpu.matmul %31, %33, %cst_37 {dimension_numbers = #tpu.dot_dimension_numbers<[1], [0], [0], [1], [0, 0, 1, 1], [], []>} : vector<16x32xf32>, vector<32x32xf32>, vector<16x32xf32> -> vector<16x32xf32>
    %35 = arith.addf %29, %34 : vector<16x32xf32>
    %c0_38 = arith.constant 0 : index
    %c0_39 = arith.constant 0 : index
    %36 = vector.load %arg6[%c0_38, %c0_39] : memref<1x32xf32, #tpu.memory_space<vmem>>, vector<1x32xf32>
    %37 = vector.broadcast %36 : vector<1x32xf32> to vector<16x32xf32>
    %38 = arith.mulf %35, %37 : vector<16x32xf32>
    %c0_40 = arith.constant 0 : index
    %c0_41 = arith.constant 0 : index
    %39 = vector.load %arg7[%c0_40, %c0_41] : memref<1x32xf32, #tpu.memory_space<vmem>>, vector<1x32xf32>
    %40 = vector.broadcast %39 : vector<1x32xf32> to vector<16x32xf32>
    %41 = arith.addf %38, %40 : vector<16x32xf32>
    %cst_42 = arith.constant 0.000000e+00 : f32
    %42 = vector.broadcast %cst_42 : f32 to vector<16x32xf32>
    %43 = arith.maximumf %41, %42 : vector<16x32xf32>
    %c0_43 = arith.constant 0 : index
    %c0_44 = arith.constant 0 : index
    %44 = vector.load %arg8[%c0_43, %c0_44] : memref<32x128xf32, #tpu.memory_space<vmem>>, vector<32x128xf32>
    %cst_45 = arith.constant dense<0.000000e+00> : vector<16x128xf32>
    %45 = tpu.matmul %43, %44, %cst_45 {dimension_numbers = #tpu.dot_dimension_numbers<[1], [0], [0], [1], [0, 0, 1, 1], [], []>} : vector<16x32xf32>, vector<32x128xf32>, vector<16x128xf32> -> vector<16x128xf32>
    %c0_46 = arith.constant 0 : index
    %c0_47 = arith.constant 0 : index
    %46 = vector.load %arg9[%c0_46, %c0_47] : memref<1x128xf32, #tpu.memory_space<vmem>>, vector<1x128xf32>
    %47 = vector.broadcast %46 : vector<1x128xf32> to vector<16x128xf32>
    %48 = arith.mulf %45, %47 : vector<16x128xf32>
    %c0_48 = arith.constant 0 : index
    %c0_49 = arith.constant 0 : index
    %49 = vector.load %arg10[%c0_48, %c0_49] : memref<1x128xf32, #tpu.memory_space<vmem>>, vector<1x128xf32>
    %50 = vector.broadcast %49 : vector<1x128xf32> to vector<16x128xf32>
    %51 = arith.addf %48, %50 : vector<16x128xf32>
    %52 = arith.addf %51, %1 : vector<16x128xf32>
    %cst_50 = arith.constant 0.000000e+00 : f32
    %53 = vector.broadcast %cst_50 : f32 to vector<16x128xf32>
    %54 = arith.maximumf %52, %53 : vector<16x128xf32>
    %55 = vector.shape_cast %54 : vector<16x128xf32> to vector<2x8x128xf32>
    %c0_51 = arith.constant 0 : index
    %c0_52 = arith.constant 0 : index
    %c0_53 = arith.constant 0 : index
    %56 = vector.load %arg11[%c0_51, %c0_52, %c0_53] : memref<2x8x128xf32, #tpu.memory_space<vmem>>, vector<2x8x128xf32>
    tpu.vector_store %arg11[%c0_51, %c0_52, %c0_53], %55 {strides = array<i32>} : memref<2x8x128xf32, #tpu.memory_space<vmem>>, vector<2x8x128xf32>,
    return
  }
  func.func @transform_0(%arg0: i32) -> (i32, i32, i32) {
    %c0_i32 = arith.constant 0 : i32
    %c0_i32_0 = arith.constant 0 : i32
    %c0_i32_1 = arith.constant 0 : i32
    return %arg0, %c0_i32, %c0_i32_0 : i32, i32, i32
  }
  func.func @transform_1(%arg0: i32) -> (i32, i32) {
    %c0_i32 = arith.constant 0 : i32
    %c0_i32_0 = arith.constant 0 : i32
    %c0_i32_1 = arith.constant 0 : i32
    return %c0_i32, %c0_i32_0 : i32, i32
  }
  func.func @transform_2(%arg0: i32) -> (i32, i32) {
    %c0_i32 = arith.constant 0 : i32
    %c0_i32_0 = arith.constant 0 : i32
    %c0_i32_1 = arith.constant 0 : i32
    return %c0_i32, %c0_i32_0 : i32, i32
  }
  func.func @transform_3(%arg0: i32) -> (i32, i32) {
    %c0_i32 = arith.constant 0 : i32
    %c0_i32_0 = arith.constant 0 : i32
    %c0_i32_1 = arith.constant 0 : i32
    return %c0_i32, %c0_i32_0 : i32, i32
  }
  func.func @transform_4(%arg0: i32) -> (i32, i32, i32) {
    %c0_i32 = arith.constant 0 : i32
    %c0_i32_0 = arith.constant 0 : i32
    %c0_i32_1 = arith.constant 0 : i32
    %c0_i32_2 = arith.constant 0 : i32
    return %c0_i32, %c0_i32_0, %c0_i32_1 : i32, i32, i32
  }
  func.func @transform_5(%arg0: i32) -> (i32, i32) {
    %c0_i32 = arith.constant 0 : i32
    %c0_i32_0 = arith.constant 0 : i32
    %c0_i32_1 = arith.constant 0 : i32
    return %c0_i32, %c0_i32_0 : i32, i32
  }
  func.func @transform_6(%arg0: i32) -> (i32, i32) {
    %c0_i32 = arith.constant 0 : i32
    %c0_i32_0 = arith.constant 0 : i32
    %c0_i32_1 = arith.constant 0 : i32
    return %c0_i32, %c0_i32_0 : i32, i32
  }
  func.func @transform_7(%arg0: i32) -> (i32, i32) {
    %c0_i32 = arith.constant 0 : i32
    %c0_i32_0 = arith.constant 0 : i32
    %c0_i32_1 = arith.constant 0 : i32
    return %c0_i32, %c0_i32_0 : i32, i32
  }
  func.func @transform_8(%arg0: i32) -> (i32, i32) {
    %c0_i32 = arith.constant 0 : i32
    %c0_i32_0 = arith.constant 0 : i32
    %c0_i32_1 = arith.constant 0 : i32
    return %c0_i32, %c0_i32_0 : i32, i32
  }
  func.func @transform_9(%arg0: i32) -> (i32, i32) {
    %c0_i32 = arith.constant 0 : i32
    %c0_i32_0 = arith.constant 0 : i32
    %c0_i32_1 = arith.constant 0 : i32
    return %c0_i32, %c0_i32_0 : i32, i32
  }
  func.func @transform_10(%arg0: i32) -> (i32, i32, i32) {
    %c0_i32 = arith.constant 0 : i32
    %c0_i32_0 = arith.constant 0 : i32
    %c0_i32_1 = arith.constant 0 : i32
    return %arg0, %c0_i32, %c0_i32_0 : i32, i32, i32
  }
}

</mosaic_0001>

<bundles_post_ra>
// kernel: tpu_custom_call.1
= control target key start
LH: loop header
LB: loop body
LE: loop exit
PB: predicated region body
PF: predicated region fallthrough
CT: control target
= control target key end

     0   :  { %s936_s0 = inlined_call_operand.vmem [shape: f32[2,8,128], index: 0, kind: input, shape index: {}]   ;;  %s937_s1 = inlined_call_operand.vmem [shape: f32[128,32], index: 1, kind: input, shape index: {}]   ;;  %s938_s2 = inlined_call_operand.vmem [shape: f32[1,32], index: 2, kind: input, shape index: {}]   ;;  %s939_s3 = inlined_call_operand.vmem [shape: f32[1,32], index: 3, kind: input, shape index: {}]   ;;  %s940_s4 = inlined_call_operand.vmem [shape: f32[3,32,32], index: 4, kind: input, shape index: {}]   ;;  %s941_s5 = inlined_call_operand.vmem [shape: f32[1,32], index: 5, kind: input, shape index: {}]   ;;  %s942_s6 = inlined_call_operand.vmem [shape: f32[1,32], index: 6, kind: input, shape index: {}]   ;;  %s943_s7 = inlined_call_operand.vmem [shape: f32[32,128], index: 7, kind: input, shape index: {}]   ;;  %s944_s8 = inlined_call_operand.vmem [shape: f32[1,128], index: 8, kind: input, shape index: {}]   ;;  %s945_s9 = inlined_call_operand.vmem [shape: f32[1,128], index: 9, kind: input, shape index: {}]   ;;  %s946_s10 = inlined_call_operand.hbm [shape: f32[2,8,128], index: 10, kind: output, shape index: {}]  }
   0x1   :  { %v53_v0 = vld [vmem:[%s937_s1 + $0x78] sm:$0xff]  ;;  %v52_v1 = vld [vmem:[%s937_s1 + $0x70] sm:$0xff]  ;;  %v51_v2 = vld [vmem:[%s937_s1 + $0x68] sm:$0xff] }
   0x2   :  { %631 = vmatprep.subr.mxu0 %v53_v0  ;;  %v50_v3 = vld [vmem:[%s937_s1 + $0x60] sm:$0xff]  ;;  %v49_v5 = vld [vmem:[%s937_s1 + $0x58] sm:$0xff] }
   0x3   :  { %632 = vmatpush3.msra.mxu0 %v53_v0  ;;  %v810_v4 = vld [vmem:[%s936_s0] sm:$0xff] }
   0x4   :  { %633 = vmatprep.subr.mxu0 %v52_v1  ;;  %663 = vmatprep.mubr.f32.mxu0 %v810_v4 }
   0x5   :  { %634 = vmatpush3.msra.mxu0 %v52_v1 }
   0x6   :  { %635 = vmatprep.subr.mxu0 %v51_v2 }
   0x7   :  { %636 = vmatpush3.msra.mxu0 %v51_v2 }
   0x8   :  { %15 = vsyncpa [#allocation4], 0  ;;  %637 = vmatprep.subr.mxu0 %v50_v3  ;;  %v48_v6 = vld [vmem:[%s937_s1 + $0x50] sm:$0xff]  ;;  %v47_v7 = vld [vmem:[%s937_s1 + $0x48] sm:$0xff]  ;;  %vm149_vm0 = vcmask 253952   ;;  %v736_v19 = vmov 0.0  }
   0x9   :  { %638 = vmatpush3.msra.mxu0 %v50_v3  ;;  %v46_v8 = vld [vmem:[%s937_s1 + $0x40] sm:$0xff]  ;;  %v45_v9 = vld [vmem:[%s937_s1 + $0x38] sm:$0xff]  ;;  %v44_v10 = vld [vmem:[%s937_s1 + $0x30] sm:$0xff]  ;;  %150 = vst.msk [vmem:[#allocation2] sm:$0x1] %vm149_vm0, %v736_v19  ;;  %vm154_vm1 = vcmask 261120  }
   0xa   :  { %639 = vmatprep.subr.mxu0 %v49_v5  ;;  %v43_v11 = vld [vmem:[%s937_s1 + $0x28] sm:$0xff]  ;;  %v42_v12 = vld [vmem:[%s937_s1 + $0x20] sm:$0xff]  ;;  %v41_v13 = vld [vmem:[%s937_s1 + $0x18] sm:$0xff]  ;;  %151 = vst.msk [vmem:[#allocation2 + $0x10] sm:$0x1] %vm149_vm0, %v736_v19 }
   0xb   :  { %640 = vmatpush3.msra.mxu0 %v49_v5  ;;  %v40_v14 = vld [vmem:[%s937_s1 + $0x10] sm:$0xff]  ;;  %v39_v15 = vld [vmem:[%s937_s1 + $0x8] sm:$0xff]  ;;  %v38_v16 = vld [vmem:[%s937_s1] sm:$0xff]  ;;  %152 = vst.msk [vmem:[#allocation2 + $0x9] sm:$0x1] %vm149_vm0, %v736_v19 }
   0xc   :  { %641 = vmatprep.subr.mxu0 %v48_v6  ;;  %v852_v17 = vld [vmem:[%s936_s0 + $0x8] sm:$0xff]  ;;  %v572_v18 = vld [vmem:[%s940_s4 + $0x38] sm:$0xff]  ;;  %153 = vst.msk [vmem:[#allocation2 + $0x19] sm:$0x1] %vm149_vm0, %v736_v19  ;;  %v571_v20 = vld [vmem:[%s940_s4 + $0x30] sm:$0xff] }
   0xd   :  { %642 = vmatpush3.msra.mxu0 %v48_v6  ;;  %666 = vmatprep.subr.mxu1 %v572_v18  ;;  %v570_v21 = vld [vmem:[%s940_s4 + $0x28] sm:$0xff]  ;;  %v569_v22 = vld [vmem:[%s940_s4 + $0x20] sm:$0xff]  ;;  %v162_v23 = vld [vmem:[%s940_s4 + $0x18] sm:$0xff] }
   0xe   :  { %643 = vmatprep.subr.mxu0 %v47_v7  ;;  %667 = vmatpush3.msra.mxu1 %v572_v18  ;;  %v567_v24 = vld [vmem:[%s938_s2] ss:$0 sm:$0xff]  ;;  %v161_v36 = vld [vmem:[%s940_s4 + $0x10] sm:$0xff]  ;;  %v160_v38 = vld [vmem:[%s940_s4 + $0x8] sm:$0xff] }
   0xf   :  { %644 = vmatpush3.msra.mxu0 %v47_v7  ;;  %668 = vmatprep.subr.mxu1 %v571_v20  ;;  %v568_v26 = vld [vmem:[%s939_s3] ss:$0 sm:$0xff]  ;;  %v580_v40 = vld [vmem:[%s940_s4 + $0x58] sm:$0xff]  ;;  %v579_v42 = vld [vmem:[%s940_s4 + $0x50] sm:$0xff] }
  0x10   :  { %645 = vmatprep.subr.mxu0 %v46_v8  ;;  %669 = vmatpush3.msra.mxu1 %v571_v20  ;;  %v159_v39 = vld [vmem:[%s940_s4] sm:$0xff]  ;;  %v578_v44 = vld [vmem:[%s940_s4 + $0x48] sm:$0xff]  ;;  %v445_v47 = vld [vmem:[%s943_s7 + $0x18] sm:$0xff] }
  0x11   :  { %646 = vmatpush3.msra.mxu0 %v46_v8  ;;  %670 = vmatprep.subr.mxu1 %v570_v21  ;;  %v577_v45 = vld [vmem:[%s940_s4 + $0x40] sm:$0xff]  ;;  %v444_v48 = vld [vmem:[%s943_s7 + $0x10] sm:$0xff]  ;;  %v443_v49 = vld [vmem:[%s943_s7 + $0x8] sm:$0xff] }
  0x12   :  { %647 = vmatprep.subr.mxu0 %v45_v9  ;;  %671 = vmatpush3.msra.mxu1 %v570_v21  ;;  %v442_v50 = vld [vmem:[%s943_s7] sm:$0xff] }
  0x13   :  { %648 = vmatpush3.msra.mxu0 %v45_v9  ;;  %672 = vmatprep.subr.mxu1 %v569_v22  ;;  %v583_v57 = vld [vmem:[%s941_s5] ss:$0 sm:$0xff] }
  0x14   :  { %649 = vmatprep.subr.mxu0 %v44_v10  ;;  %673 = vmatpush3.msra.mxu1 %v569_v22  ;;  %v584_v62 = vld [vmem:[%s942_s6] ss:$0 sm:$0xff]  ;;  %s737_s6 = smov [#allocation3]  }
  0x15   :  { %650 = vmatpush3.msra.mxu0 %v44_v10  ;;  %677 = vmatprep.subr.mxu1 %v162_v23  ;;  %v587_v6 = vld [vmem:[%s944_s8] ss:$0 sm:$0xff]  ;;  %s556_s22 = sshll.u32 %s737_s6, 4  ;;  %s557_s22 = int_to_ptr.vmem [resolvable:$true] %s556_s22 }
  0x16   :  { %651 = vmatprep.subr.mxu0 %v43_v11  ;;  %v588_v8 = vld [vmem:[%s945_s9] ss:$0 sm:$0xff]  ;;  %s714_s8 = scalar_lea.vmem %s557_s22, 256  ;;  %p719_p1 = scmp.lt.s32.totalorder %s557_s22, %s557_s22 }
  0x17   :  { %652 = vmatpush3.msra.mxu0 %v43_v11  ;;  %p715_p0 = scmp.ne.s32.totalorder %s557_s22, %s714_s8  ;;  %p720_p2 = scmp.lt.s32.totalorder %s714_s8, %s714_s8 }
  0x18   :  { %653 = vmatprep.subr.mxu0 %v42_v12 }
  0x19   :  { %654 = vmatpush3.msra.mxu0 %v42_v12  ;;  %p721_p3 = por %p720_p2, %p719_p1 }
  0x1a   :  { %655 = vmatprep.subr.mxu0 %v41_v13 }
  0x1b   :  { %656 = vmatpush3.msra.mxu0 %v41_v13  ;;  %p722_p4 = pnand %p721_p3, %p715_p0 }
  0x1c   :  { %657 = vmatprep.subr.mxu0 %v40_v14 }
  0x1d   :  { %658 = vmatpush3.msra.mxu0 %v40_v14 }
  0x1e   :  { %659 = vmatprep.subr.mxu0 %v39_v15 }
  0x1f   :  { %660 = vmatpush3.msra.mxu0 %v39_v15 }
  0x20   :  { %661 = vmatprep.subr.mxu0 %v38_v16 }
  0x21   :  { %662 = vmatpush3.msra.mxu0 %v38_v16 }
  0x22   :  { %664 = vmatmul.mubr.f32.vlgmr.msra.gmra.mxu0 %v852_v17 }
  0xe2   :  { %v665_v25 = vpop.f32.mrf.mxu0 }
  0xe3   :  { %v137_v27 = vmul.f32 %v665_v25, %v567_v24 }
  0xe4   :  { %v120_v28 = vpop.f32.mrf.mxu0 }
  0xe5   :  { %v146_v29 = vadd.f32 %v568_v26, %v137_v27  ;;  %v136_v30 = vmul.f32 %v567_v24, %v120_v28 }
  0xe7   :  { %v148_v31 = vmax.f32 %v146_v29, 0.0  ;;  %v145_v32 = vadd.f32 %v568_v26, %v136_v30 }
  0xe9   :  { %156 = vst.msk [vmem:[#allocation2 + $0x11] sm:$0xff] %vm154_vm1, %v148_v31  ;;  %v147_v33 = vmax.f32 %v145_v32, 0.0 }
  0xeb   :  { %155 = vst.msk [vmem:[#allocation2 + $0x1] sm:$0xff] %vm154_vm1, %v147_v33 }
  0xf0   :  { %v164_v35 = vld [vmem:[#allocation2 + $0x11] sm:$0xff] }
  0xf1   :  { %v158_v41 = vld [vmem:[#allocation2 + $0x10] sm:$0xff] }
  0xf2   :  { %v163_v34 = vld [vmem:[#allocation2 + $0x1] sm:$0xff]  ;;  %v333_v46 = vld [vmem:[#allocation2 + $0x12] sm:$0xff] }
  0xf3   :  { %674 = vmatprep.mubr.msk.f32.mxu1 %vm154_vm1, %v163_v34  ;;  %v157_v37 = vld [vmem:[#allocation2] sm:$0xff] }
  0xf4   :  { %675 = vmatmul.mubr.msk.f32.vlgmr.msra.gmra.mxu1 %vm154_vm1, %v164_v35  ;;  %v332_v43 = vld [vmem:[#allocation2 + $0x2] sm:$0xff] }
  0xf5   :  { %678 = vmatpush3.msra.mxu1 %v162_v23  ;;  %685 = vmatprep.mubr.msk.f32.mxu1 %vm154_vm1, %v157_v37 }
  0xf6   :  { %679 = vmatprep.subr.mxu1 %v161_v36 }
  0xf7   :  { %680 = vmatpush3.msra.mxu1 %v161_v36 }
  0xf8   :  { %681 = vmatprep.subr.mxu1 %v160_v38 }
  0xf9   :  { %682 = vmatpush3.msra.mxu1 %v160_v38 }
  0xfa   :  { %683 = vmatprep.subr.mxu1 %v159_v39 }
  0xfb   :  { %684 = vmatpush3.msra.mxu1 %v159_v39 }
  0xfc   :  { %686 = vmatmul.mubr.msk.f32.vlgmr.msra.gmra.mxu1 %vm154_vm1, %v158_v41  ;;  %688 = vmatprep.subr.mxu1 %v580_v40 }
  0xfd   :  { %689 = vmatpush3.msra.mxu1 %v580_v40  ;;  %696 = vmatprep.mubr.msk.f32.mxu1 %vm154_vm1, %v332_v43 }
  0xfe   :  { %690 = vmatprep.subr.mxu1 %v579_v42 }
  0xff   :  { %691 = vmatpush3.msra.mxu1 %v579_v42 }
 0x100   :  { %692 = vmatprep.subr.mxu1 %v578_v44 }
 0x101   :  { %693 = vmatpush3.msra.mxu1 %v578_v44 }
 0x102   :  { %694 = vmatprep.subr.mxu1 %v577_v45 }
 0x103   :  { %695 = vmatpush3.msra.mxu1 %v577_v45 }
 0x104   :  { %697 = vmatmul.mubr.msk.f32.vlgmr.msra.gmra.mxu1 %vm154_vm1, %v333_v46  ;;  %699 = vmatprep.subr.mxu1 %v445_v47 }
 0x105   :  { %700 = vmatpush3.msra.mxu1 %v445_v47 }
 0x106   :  { %701 = vmatprep.subr.mxu1 %v444_v48 }
 0x107   :  { %702 = vmatpush3.msra.mxu1 %v444_v48 }
 0x108   :  { %703 = vmatprep.subr.mxu1 %v443_v49 }
 0x109   :  { %704 = vmatpush3.msra.mxu1 %v443_v49 }
 0x10a   :  { %705 = vmatprep.subr.mxu1 %v442_v50 }
 0x10b   :  { %706 = vmatpush3.msra.mxu1 %v442_v50 }
 0x1b4   :  { %v676_v51 = vpop.f32.mrf.mxu1 }
 0x1b6   :  { %v242_v52 = vpop.f32.mrf.mxu1 }
 0x1bc   :  { %v687_v53 = vpop.f32.mrf.mxu1 }
 0x1bd   :  { %v329_v55 = vadd.f32 %v687_v53, %v676_v51 }
 0x1be   :  { %v323_v54 = vpop.f32.mrf.mxu1 }
 0x1bf   :  { %v324_v58 = vadd.f32 %v323_v54, %v242_v52 }
 0x1c4   :  { %v698_v56 = vpop.f32.mrf.mxu1 }
 0x1c5   :  { %v421_v59 = vadd.f32 %v698_v56, %v329_v55 }
 0x1c6   :  { %v411_v60 = vpop.f32.mrf.mxu1 }
 0x1c7   :  { %v430_v61 = vmul.f32 %v583_v57, %v421_v59  ;;  %v420_v63 = vadd.f32 %v411_v60, %v324_v58 }
 0x1c9   :  { %v429_v0 = vmul.f32 %v583_v57, %v420_v63  ;;  %v439_v1 = vadd.f32 %v584_v62, %v430_v61 }
 0x1cb   :  { %v438_v2 = vadd.f32 %v584_v62, %v429_v0  ;;  %v441_v5 = vmax.f32 %v439_v1, 0.0 }
 0x1cd   :  { %v440_v3 = vmax.f32 %v438_v2, 0.0 }
 0x1cf   :  { %707 = vmatprep.mubr.msk.f32.mxu1 %vm154_vm1, %v440_v3 }
 0x1d0   :  { %708 = vmatmul.mubr.msk.f32.vlgmr.msra.gmra.mxu1 %vm154_vm1, %v441_v5 }
 0x290   :  { %v709_v7 = vpop.f32.mrf.mxu1 }
 0x291   :  { %v535_v9 = vmul.f32 %v709_v7, %v587_v6 }
 0x292   :  { %v518_v10 = vpop.f32.mrf.mxu1 }
 0x293   :  { %v544_v11 = vadd.f32 %v588_v8, %v535_v9  ;;  %v534_v12 = vmul.f32 %v587_v6, %v518_v10 }
 0x295   :  { %v546_v13 = vadd.f32 %v544_v11, %v852_v17  ;;  %v543_v14 = vadd.f32 %v588_v8, %v534_v12 }
 0x297   :  { %v548_v15 = vmax.f32 %v546_v13, 0.0  ;;  %v545_v16 = vadd.f32 %v543_v14, %v810_v4 }
 0x299   :  { %550 = vst [vmem:[#allocation3 + $0x8] sm:$0xff] %v548_v15  ;;  %v547_v18 = vmax.f32 %v545_v16, 0.0 }
 0x29b   :  { %549 = vst [vmem:[#allocation3] sm:$0xff] %v547_v18 }
 0x29c   :  { %725 = shalt.err (!%p722_p4)
}
 0x29d   :  { %s738_s9 = smov 128   ;;  %s739_s23 = smov 8  }
 0x29e   :  { %562 = dma.vmem_to_hbm [thread:$0]  %s557_s22, 256, %s946_s10, [#allocation4], %s738_s9, %s738_s9, %s739_s23  }
 0x29f   :  { %734 = dma.done.wait [#allocation4], 256  }
 0x2a0   :  { %735 = vsyncadd [#allocation4], 4294967040 }
 0x2a1   :  { %566 = vsyncpa [#allocation4], 1 }

</bundles_post_ra>
